<compile_context>
chip_gen: v7x
topology: tpu7x:2x2x1
jax: 0.10.0
libtpu: 0.0.40
codegen_flags: <defaults>
</compile_context>

<pallas_src>
import functools

import jax
import jax.numpy as jnp
from jax.experimental import pallas as pl
from jax.experimental.pallas import tpu as pltpu


def _round_up(n, m):
    return ((n + m - 1) // m) * m


def _recip(v):
    # EUP approximate reciprocal (its own bundle slot -> essentially free) plus
    # one Newton-Raphson refinement on the VPU to recover full f32 accuracy,
    # keeping the max(norm, eps) clamp semantics of torch's F.normalize.
    r = pl.reciprocal(v, approx=True)
    return r * (jnp.float32(2.0) - v * r)


def _ocsoftmax_kernel(x_ref, labels_ref, center_ref, scores_ref, psum_ref, *,
                      m_real, m_fake, alpha, batch, block_b):
    eps = jnp.float32(1e-12)  # torch.nn.functional.normalize default

    x = x_ref[...].astype(jnp.float32)            # (D, TB)  cast per-tile in VMEM
    labels = labels_ref[...]                      # (1, TB)  int32
    c = center_ref[...].astype(jnp.float32)       # (D, 1)

    # L2-normalize the center (tiny: D elements).
    c_norm = jnp.sqrt(jnp.sum(c * c, axis=0, keepdims=True))        # (1, 1)
    w = c * _recip(jnp.maximum(c_norm, eps))                        # (D, 1)

    # scores = <x/||x||, w> per column.  Do NOT materialize normalized x:
    # compute the dot product first, then scale by 1/||x|| (O(B) not O(B*D)).
    dot = jnp.sum(x * w, axis=0, keepdims=True)                     # (1, TB)
    x_norm = jnp.sqrt(jnp.sum(x * x, axis=0, keepdims=True))        # (1, TB)
    scores = dot * _recip(jnp.maximum(x_norm, eps))                 # (1, TB)

    # Unmodified scores are the second output (output_scores.clone()),
    # written lane-dense.
    scores_ref[...] = scores

    # Margin adjustment.  Keep the where-form: masks are disjoint, both read
    # the original scores, and labels outside {0,1} leave scores unmodified
    # (matches torch).
    adj = jnp.where(labels == 0, jnp.float32(m_real) - scores, scores)
    adj = jnp.where(labels == 1, scores - jnp.float32(m_fake), adj)

    # softplus(alpha * adj), numerically stable: max(z,0) + log1p(exp(-|z|))
    z = jnp.float32(alpha) * adj
    sp = jnp.maximum(z, 0.0) + jnp.log1p(jnp.exp(-jnp.abs(z)))

    # Mask out padded batch columns, then emit this tile's partial sum.
    col = (jax.lax.broadcasted_iota(jnp.int32, (1, block_b), 1)
           + pl.program_id(0) * block_b)
    sp = jnp.where(col < batch, sp, 0.0)
    psum_ref[...] = jnp.sum(sp).reshape(1, 1)


def ocsoftmax_forward(x, labels, center,
                      m_real=0.5, m_fake=0.2, alpha=20.0, block_b=1024):
    """Pallas OCSoftmax forward.

    Args:
      x:      (B, D) float features (any float dtype; cast to f32 in-kernel).
      labels: (B,)   int labels (0 = real, 1 = fake).
      center: (1, D) float center parameter.
    Returns:
      (loss scalar f32, output_scores (B,) f32)
    """
    B, D = x.shape

    # Batch tile on the lane axis (multiple of 128), batch padded to a tile.
    tb = min(block_b, _round_up(B, 128))
    b_pad = _round_up(B, tb)
    num_tiles = b_pad // tb

    # Lane-dense layout plumbing in the wrapper (no dtype cast here: for bf16
    # inputs the cast happens per-tile in VMEM instead of doubling HBM bytes).
    x_t = jnp.pad(x.T, ((0, 0), (0, b_pad - B)))                         # (D, Bp)
    labels_t = jnp.pad(labels.reshape(1, B).astype(jnp.int32),
                       ((0, 0), (0, b_pad - B)))                         # (1, Bp)
    center_t = center.T                                                  # (D, 1)

    kernel = functools.partial(
        _ocsoftmax_kernel,
        m_real=float(m_real), m_fake=float(m_fake), alpha=float(alpha),
        batch=B, block_b=tb)

    scores_t, psums = pl.pallas_call(
        kernel,
        out_shape=(
            jax.ShapeDtypeStruct((1, b_pad), jnp.float32),       # scores (lane-dense)
            jax.ShapeDtypeStruct((num_tiles, 1), jnp.float32),   # per-tile loss sums
        ),
        grid=(num_tiles,),
        in_specs=[
            pl.BlockSpec((D, tb), lambda i: (0, i)),
            pl.BlockSpec((1, tb), lambda i: (0, i)),
            pl.BlockSpec((D, 1), lambda i: (0, 0)),
        ],
        out_specs=(
            pl.BlockSpec((1, tb), lambda i: (0, i)),
            pl.BlockSpec((1, 1), lambda i: (i, 0)),
        ),
        compiler_params=pltpu.CompilerParams(
            dimension_semantics=("parallel",),   # no carried accumulator
            vmem_limit_bytes=32 * 1024 * 1024,   # fits v7x's smaller VMEM too
        ),
    )(x_t, labels_t, center_t)

    loss = jnp.sum(psums) / jnp.float32(B)
    return loss, scores_t[0, :B]


if __name__ == "__main__":
    key = jax.random.PRNGKey(0)
    B, D = 8, 2  # batch=8, feat_dim=2 (module default)

    kx, _ = jax.random.split(key)
    x = jax.random.normal(kx, (B, D), dtype=jnp.float32)
    labels = jnp.array([0, 1, 0, 1, 1, 0, 0, 1], dtype=jnp.int32)

    # Deterministic parameter init: initialize_centers='one_hot' -> eye(D)[:1]
    center = jnp.eye(D, dtype=jnp.float32)[:1]  # (1, D)

    loss, scores = ocsoftmax_forward(x, labels, center,
                                     m_real=0.5, m_fake=0.2, alpha=20.0)
    jax.block_until_ready((loss, scores))

    # Reference check in plain JAX (same math, no Pallas).
    eps = 1e-12
    w = center / jnp.maximum(jnp.linalg.norm(center, axis=1, keepdims=True), eps)
    xn = x / jnp.maximum(jnp.linalg.norm(x, axis=1, keepdims=True), eps)
    s = xn @ w.T
    adj = jnp.where(labels[:, None] == 0, 0.5 - s, s)
    adj = jnp.where(labels[:, None] == 1, s - 0.2, adj)
    ref_loss = jnp.mean(jax.nn.softplus(20.0 * adj))
    ref_scores = s[:, 0]

    assert jnp.allclose(loss, ref_loss, atol=1e-4, rtol=1e-4), (loss, ref_loss)
    assert jnp.allclose(scores, ref_scores, atol=1e-4, rtol=1e-4)
    print("KERNEL_OK")
</pallas_src>

<mosaic_0001>
module attributes {stable_mosaic.version = 11 : i64} {
  func.func @_ocsoftmax_kernel(%arg0: i32, %arg1: memref<2x128xf32, #tpu.memory_space<vmem>>, %arg2: memref<1x128xi32, #tpu.memory_space<vmem>>, %arg3: memref<2x1xf32, #tpu.memory_space<vmem>>, %arg4: memref<1x128xf32, #tpu.memory_space<vmem>>, %arg5: memref<1x1xf32, #tpu.memory_space<vmem>>) attributes {dimension_semantics = [#tpu.dimension_semantics<parallel>], iteration_bounds = array<i64: 1>, scalar_prefetch = 0 : i64, scratch_operands = 0 : i64, tpu.core_type = #tpu.core_type<tc>, window_params = [{transform_indices = @transform_0, window_bounds = array<i64: 2, 128>}, {transform_indices = @transform_1, window_bounds = array<i64: 1, 128>}, {pipeline_mode = #tpu.pipeline_mode<synchronous>, transform_indices = @transform_2, window_bounds = array<i64: 2, 1>}, {transform_indices = @transform_3, window_bounds = array<i64: 1, 128>}, {transform_indices = @transform_4, window_bounds = array<i64: 1, 1>}]} {
    %c0 = arith.constant 0 : index
    %c0_0 = arith.constant 0 : index
    %0 = vector.load %arg1[%c0, %c0_0] : memref<2x128xf32, #tpu.memory_space<vmem>>, vector<2x128xf32>
    %c0_1 = arith.constant 0 : index
    %c0_2 = arith.constant 0 : index
    %1 = vector.load %arg2[%c0_1, %c0_2] : memref<1x128xi32, #tpu.memory_space<vmem>>, vector<1x128xi32>
    %c0_3 = arith.constant 0 : index
    %c0_4 = arith.constant 0 : index
    %2 = vector.load %arg3[%c0_3, %c0_4] : memref<2x1xf32, #tpu.memory_space<vmem>>, vector<2x1xf32>
    %3 = arith.mulf %2, %2 : vector<2x1xf32>
    %cst = arith.constant dense<0.000000e+00> : vector<1xf32>
    %4 = vector.multi_reduction <add>, %3, %cst [0] : vector<2x1xf32> to vector<1xf32>
    %5 = vector.shape_cast %4 : vector<1xf32> to vector<1x1xf32>
    %6 = math.sqrt %5 : vector<1x1xf32>
    %cst_5 = arith.constant 9.99999996E-13 : f32
    %7 = vector.broadcast %cst_5 : f32 to vector<1x1xf32>
    %8 = arith.maximumf %6, %7 : vector<1x1xf32>
    %9 = tpu.reciprocal %8 {approx = true} : vector<1x1xf32> -> vector<1x1xf32>
    %10 = arith.mulf %8, %9 : vector<1x1xf32>
    %cst_6 = arith.constant 2.000000e+00 : f32
    %11 = vector.broadcast %cst_6 : f32 to vector<1x1xf32>
    %12 = arith.subf %11, %10 : vector<1x1xf32>
    %13 = arith.mulf %9, %12 : vector<1x1xf32>
    %14 = vector.broadcast %13 : vector<1x1xf32> to vector<2x1xf32>
    %15 = arith.mulf %2, %14 : vector<2x1xf32>
    %16 = vector.broadcast %15 : vector<2x1xf32> to vector<2x128xf32>
    %17 = arith.mulf %0, %16 : vector<2x128xf32>
    %cst_7 = arith.constant dense<0.000000e+00> : vector<128xf32>
    %18 = vector.multi_reduction <add>, %17, %cst_7 [0] : vector<2x128xf32> to vector<128xf32>
    %19 = vector.shape_cast %18 : vector<128xf32> to vector<1x128xf32>
    %20 = arith.mulf %0, %0 : vector<2x128xf32>
    %cst_8 = arith.constant dense<0.000000e+00> : vector<128xf32>
    %21 = vector.multi_reduction <add>, %20, %cst_8 [0] : vector<2x128xf32> to vector<128xf32>
    %22 = vector.shape_cast %21 : vector<128xf32> to vector<1x128xf32>
    %23 = math.sqrt %22 : vector<1x128xf32>
    %cst_9 = arith.constant 9.99999996E-13 : f32
    %24 = vector.broadcast %cst_9 : f32 to vector<1x128xf32>
    %25 = arith.maximumf %23, %24 : vector<1x128xf32>
    %26 = tpu.reciprocal %25 {approx = true} : vector<1x128xf32> -> vector<1x128xf32>
    %27 = arith.mulf %25, %26 : vector<1x128xf32>
    %cst_10 = arith.constant 2.000000e+00 : f32
    %28 = vector.broadcast %cst_10 : f32 to vector<1x128xf32>
    %29 = arith.subf %28, %27 : vector<1x128xf32>
    %30 = arith.mulf %26, %29 : vector<1x128xf32>
    %31 = arith.mulf %19, %30 : vector<1x128xf32>
    %c0_11 = arith.constant 0 : index
    %c0_12 = arith.constant 0 : index
    %32 = vector.load %arg4[%c0_11, %c0_12] : memref<1x128xf32, #tpu.memory_space<vmem>>, vector<1x128xf32>
    tpu.vector_store %arg4[%c0_11, %c0_12], %31 {strides = array<i32>} : memref<1x128xf32, #tpu.memory_space<vmem>>, vector<1x128xf32>,
    %c0_i32 = arith.constant 0 : i32
    %33 = vector.broadcast %c0_i32 : i32 to vector<1x128xi32>
    %34 = arith.cmpi eq, %1, %33 : vector<1x128xi32>
    %cst_13 = arith.constant 5.000000e-01 : f32
    %35 = vector.broadcast %cst_13 : f32 to vector<1x128xf32>
    %36 = arith.subf %35, %31 : vector<1x128xf32>
    %37 = arith.select %34, %36, %31 : vector<1x128xi1>, vector<1x128xf32>
    %c1_i32 = arith.constant 1 : i32
    %38 = vector.broadcast %c1_i32 : i32 to vector<1x128xi32>
    %39 = arith.cmpi eq, %1, %38 : vector<1x128xi32>
    %cst_14 = arith.constant 2.000000e-01 : f32
    %40 = vector.broadcast %cst_14 : f32 to vector<1x128xf32>
    %41 = arith.subf %31, %40 : vector<1x128xf32>
    %42 = arith.select %39, %41, %37 : vector<1x128xi1>, vector<1x128xf32>
    %cst_15 = arith.constant 2.000000e+01 : f32
    %43 = vector.broadcast %cst_15 : f32 to vector<1x128xf32>
    %44 = arith.mulf %43, %42 : vector<1x128xf32>
    %cst_16 = arith.constant 0.000000e+00 : f32
    %45 = vector.broadcast %cst_16 : f32 to vector<1x128xf32>
    %46 = arith.maximumf %44, %45 : vector<1x128xf32>
    %47 = math.absf %44 : vector<1x128xf32>
    %cst_17 = arith.constant 0.000000e+00 : f32
    %48 = vector.broadcast %cst_17 : f32 to vector<1x128xf32>
    %49 = arith.subf %48, %47 : vector<1x128xf32>
    %50 = math.exp %49 : vector<1x128xf32>
    %51 = math.log1p %50 : vector<1x128xf32>
    %52 = arith.addf %46, %51 : vector<1x128xf32>
    %53 = tpu.iota {dimensions = array<i32: 1>} : vector<1x128xi32>
    %c128_i32 = arith.constant 128 : i32
    %54 = arith.muli %arg0, %c128_i32 : i32
    %55 = vector.broadcast %54 : i32 to vector<1x128xi32>
    %56 = arith.addi %53, %55 : vector<1x128xi32>
    %c8_i32 = arith.constant 8 : i32
    %57 = vector.broadcast %c8_i32 : i32 to vector<1x128xi32>
    %58 = arith.cmpi slt, %56, %57 : vector<1x128xi32>
    %cst_18 = arith.constant 0.000000e+00 : f32
    %59 = vector.broadcast %cst_18 : f32 to vector<1x128xf32>
    %60 = arith.select %58, %52, %59 : vector<1x128xi1>, vector<1x128xf32>
    %61 = vector.shape_cast %60 : vector<1x128xf32> to vector<1x1x128xf32>
    %cst_19 = arith.constant dense<0.000000e+00> : vector<1xf32>
    %62 = vector.multi_reduction <add>, %61, %cst_19 [1, 2] : vector<1x1x128xf32> to vector<1xf32>
    %63 = vector.shape_cast %62 : vector<1xf32> to vector<1x1x1xf32>
    %64 = vector.extract %63[0, 0, 0] : f32 from vector<1x1x1xf32>
    %65 = vector.broadcast %64 : f32 to vector<1x1xf32>
    %c0_20 = arith.constant 0 : index
    %c0_21 = arith.constant 0 : index
    %66 = vector.load %arg5[%c0_20, %c0_21] : memref<1x1xf32, #tpu.memory_space<vmem>>, vector<1x1xf32>
    tpu.vector_store %arg5[%c0_20, %c0_21], %65 {strides = array<i32>} : memref<1x1xf32, #tpu.memory_space<vmem>>, vector<1x1xf32>,
    return
  }
  func.func @transform_0(%arg0: i32) -> (i32, i32) {
    %c0_i32 = arith.constant 0 : i32
    %c0_i32_0 = arith.constant 0 : i32
    return %c0_i32, %arg0 : i32, i32
  }
  func.func @transform_1(%arg0: i32) -> (i32, i32) {
    %c0_i32 = arith.constant 0 : i32
    %c0_i32_0 = arith.constant 0 : i32
    return %c0_i32, %arg0 : i32, i32
  }
  func.func @transform_2(%arg0: i32) -> (i32, i32) {
    %c0_i32 = arith.constant 0 : i32
    %c0_i32_0 = arith.constant 0 : i32
    %c0_i32_1 = arith.constant 0 : i32
    return %c0_i32, %c0_i32_0 : i32, i32
  }
  func.func @transform_3(%arg0: i32) -> (i32, i32) {
    %c0_i32 = arith.constant 0 : i32
    %c0_i32_0 = arith.constant 0 : i32
    return %c0_i32, %arg0 : i32, i32
  }
  func.func @transform_4(%arg0: i32) -> (i32, i32) {
    %c0_i32 = arith.constant 0 : i32
    %c0_i32_0 = arith.constant 0 : i32
    return %arg0, %c0_i32 : i32, i32
  }
}

</mosaic_0001>

<bundles_post_ra>
// kernel: tpu_custom_call.1
= control target key start
LH: loop header
LB: loop body
LE: loop exit
PB: predicated region body
PF: predicated region fallthrough
CT: control target
= control target key end

     0   :  { %10 = vsyncpa [#allocation3], 0  ;;  %vm22_vm0 = vcmask 1024   ;;  %v217_v1 = vmov 0   ;;  %s280_s0 = inlined_call_operand.vmem [shape: f32[2,128], index: 0, kind: input, shape index: {}]   ;;  %s281_s1 = inlined_call_operand.vmem [shape: s32[1,128], index: 1, kind: input, shape index: {}]   ;;  %s282_s2 = inlined_call_operand.vmem [shape: f32[2,1], index: 2, kind: input, shape index: {}]   ;;  %s283_s3 = inlined_call_operand.hbm [shape: f32[1,128], index: 3, kind: output, shape index: {0}]   ;;  %s284_s4 = inlined_call_operand.hbm [shape: f32[1,1], index: 4, kind: output, shape index: {1}]  }
   0x1   :  { %v20_v0 = vld [vmem:[%s282_s2] sm:$0x3]  ;;  %156 = vset.pattern.permute.xlu0 %v217_v1 }
   0x2   :  { %v21_v2 = vmul.f32 %v20_v0, %v20_v0 }
   0x3   :  { %11 = vsyncpa [#allocation5], 0  ;;  %v18_v21 = vld [vmem:[%s280_s0] sm:$0x3]  ;;  %vm49_vm3 = vcmask 1041408   ;;  %v101_v62 = vlaneseq  ;;  %vm108_vm10 = vcmask 1040384  }
   0x4   :  { %v23_v3 = vsel %vm22_vm0, %v21_v2, 0.0  ;;  %v57_v22 = vmul.f32 %v18_v21, %v18_v21  ;;  %v19_v49 = vld [vmem:[%s281_s1] sm:$0x1]  ;;  %s218_s1 = smov [#allocation2]  }
   0x5   :  { %v24_v4 = vrot.slane %v23_v3, 4  ;;  %vm79_vm6 = vcmp.eq.s32.totalorder %v19_v49, 0  ;;  %vm82_vm7 = vcmp.eq.s32.totalorder %v19_v49, 1  ;;  %v102_v1 = vand.u32 127, %v101_v62  ;;  %s128_s19 = sshll.u32 %s218_s1, 4  ;;  %s129_s19 = int_to_ptr.vmem [resolvable:$true] %s128_s19 }
   0x6   :  { %v58_v23 = vsel %vm49_vm3, %v57_v22, 0.0  ;;  %s169_s20 = scalar_lea.vmem %s129_s19, 16  ;;  %s173_s21 = scalar_lea.vmem %s129_s19, 32 }
   0x7   :  { %v25_v5 = vadd.f32 %v24_v4, %v23_v3  ;;  %v59_v24 = vrot.slane %v58_v23, 4  ;;  %vm106_vm9 = vcmp.lt.s32.totalorder %v102_v1, 8  ;;  %p170_p0 = scmp.ne.s32.totalorder %s129_s19, %s169_s20  ;;  %p174_p1 = scmp.lt.s32.totalorder %s129_s19, %s129_s19 }
   0x8   :  { %p175_p2 = scmp.lt.s32.totalorder %s173_s21, %s169_s20 }
   0x9   :  { %v26_v6 = vrot.slane %v25_v5, 2  ;;  %v60_v25 = vadd.f32 %v59_v24, %v58_v23 }
   0xa   :  { %p176_p3 = por %p175_p2, %p174_p1 }
   0xb   :  { %v27_v7 = vadd.f32 %v26_v6, %v25_v5  ;;  %v61_v26 = vrot.slane %v60_v25, 2 }
   0xc   :  { %p177_p4 = pnand %p176_p3, %p170_p0 }
   0xd   :  { %v28_v8 = vrot.slane %v27_v7, 1  ;;  %v62_v27 = vadd.f32 %v61_v26, %v60_v25 }
   0xf   :  { %v29_v9 = vadd.f32 %v28_v8, %v27_v7  ;;  %v63_v28 = vrot.slane %v62_v27, 1 }
  0x11   :  { %157 = vrsqrt.f32 %v29_v9  ;;  %vm32_vm1 = vcmp.eq.f32.partialorder %v29_v9, inf  ;;  %v35_v11 = vand.u32 2147483648, %v29_v9  ;;  %vm34_vm2 = vcmp.eq.f32.partialorder %v29_v9, 0.0 }
  0x12   :  { %v64_v29 = vadd.f32 %v63_v28, %v62_v27 }
  0x14   :  { %vm67_vm4 = vcmp.eq.f32.partialorder %v64_v29, inf  ;;  %v70_v32 = vand.u32 2147483648, %v64_v29  ;;  %vm69_vm5 = vcmp.eq.f32.partialorder %v64_v29, 0.0 }
  0x1b   :  { %v158_v10 = vpop.eup %157 }
  0x1c   :  { %v31_v12 = vmul.f32 %v158_v10, %v29_v9 }
  0x1e   :  { %v33_v13 = vsel %vm32_vm1, %v29_v9, %v31_v12 }
  0x1f   :  { %v36_v14 = vsel %vm34_vm2, %v35_v11, %v33_v13 }
  0x20   :  { %v37_v15 = vmax.f32 %v36_v14, 1e-12 }
  0x22   :  { %159 = vrcp.f32 %v37_v15 }
  0x23   :  { %161 = vrsqrt.f32 %v64_v29 }
  0x2c   :  { %v160_v16 = vpop.eup %159 }
  0x2d   :  { %v39_v17 = vmul.f32 %v160_v16, %v37_v15  ;;  %v162_v30 = vpop.eup %161 }
  0x2e   :  { %v66_v31 = vmul.f32 %v162_v30, %v64_v29 }
  0x2f   :  { %v40_v18 = vsub.f32 2.0, %v39_v17 }
  0x30   :  { %v68_v33 = vsel %vm67_vm4, %v64_v29, %v66_v31 }
  0x31   :  { %v41_v19 = vmul.f32 %v160_v16, %v40_v18  ;;  %v71_v34 = vsel %vm69_vm5, %v70_v32, %v68_v33 }
  0x32   :  { %v72_v35 = vmax.f32 %v71_v34, 1e-12 }
  0x33   :  { %v42_v20 = vmul.f32 %v41_v19, %v20_v0 }
  0x34   :  { %163 = vrcp.f32 %v72_v35 }
  0x35   :  { %45 = vperm.xlu0 %156, %v42_v20  }
  0x3e   :  { %v164_v37 = vpop.eup %163 }
  0x3f   :  { %v74_v41 = vmul.f32 %v164_v37, %v72_v35 }
  0x41   :  { %v75_v44 = vsub.f32 2.0, %v74_v41 }
  0x43   :  { %v76_v47 = vmul.f32 %v164_v37, %v75_v44 }
  0xb4   :  { %v46_v36 = vpop.permute.xlu0 %45 }
  0xb5   :  { %v48_v38 = vmul.f32 %v46_v36, %v18_v21 }
  0xb7   :  { %v50_v39 = vsel %vm49_vm3, %v48_v38, 0.0 }
  0xb8   :  { %v51_v40 = vrot.slane %v50_v39, 4 }
  0xba   :  { %v52_v42 = vadd.f32 %v51_v40, %v50_v39 }
  0xbc   :  { %v53_v43 = vrot.slane %v52_v42, 2 }
  0xbe   :  { %v54_v45 = vadd.f32 %v53_v43, %v52_v42 }
  0xc0   :  { %v55_v46 = vrot.slane %v54_v45, 1 }
  0xc2   :  { %v56_v48 = vadd.f32 %v55_v46, %v54_v45 }
  0xc4   :  { %v77_v50 = vmul.f32 %v76_v47, %v56_v48 }
  0xc6   :  { %78 = vst [vmem:[#allocation2] sm:$0x1] %v77_v50  ;;  %v80_v51 = vsub.f32 0.5, %v77_v50  ;;  %v150_v52 = vadd.f32 -0.2, %v77_v50 }
  0xc8   :  { %v81_v53 = vsel %vm79_vm6, %v80_v51, %v77_v50 }
  0xc9   :  { %v84_v54 = vsel %vm82_vm7, %v150_v52, %v81_v53 }
  0xca   :  { %v85_v55 = vmul.f32 20.0, %v84_v54 }
  0xcc   :  { %v87_v56 = vand.u32 2147483647, %v85_v55  ;;  %v86_v5 = vmax.f32 %v85_v55, 0.0 }
  0xce   :  { %v88_v57 = vsub.f32 0.0, %v87_v56 }
  0xd0   :  { %v89_v58 = vmul.f32 1.442695, %v88_v57 }
  0xd2   :  { %165 = vpow2.f32 %v89_v58 }
  0xdc   :  { %v166_v59 = vpop.eup %165 }
  0xdd   :  { %v91_v60 = vadd.f32 1.0, %v166_v59  ;;  %v94_v61 = vmul.f32 -0.5, %v166_v59  ;;  %v97_v0 = vand.u32 2147483647, %v166_v59 }
  0xdf   :  { %167 = vlog2.f32 %v91_v60  ;;  %v95_v63 = vadd.f32 1.0, %v94_v61  ;;  %vm98_vm8 = vcmp.lt.f32.partialorder %v97_v0, 0.0004427343 }
  0xe1   :  { %v96_v4 = vmul.f32 %v166_v59, %v95_v63 }
  0xe9   :  { %v168_v2 = vpop.eup %167 }
  0xea   :  { %v93_v3 = vmul.f32 0.6931472, %v168_v2 }
  0xec   :  { %v99_v6 = vsel %vm98_vm8, %v96_v4, %v93_v3 }
  0xed   :  { %v100_v7 = vadd.f32 %v99_v6, %v86_v5 }
  0xef   :  { %v107_v8 = vsel %vm106_vm9, %v100_v7, 0.0 }
  0xf0   :  { %v109_v9 = vsel %vm108_vm10, %v107_v8, 0.0 }
  0xf1   :  { %110 = vadd.xlane.f32.xlu0 %v109_v9 }
  0xf2   :  { %180 = shalt.err (!%p177_p4)
}
  0xf3   :  { %s181_s24 = scalar_lea.hbm %s283_s3, 16 }
  0xf4   :  { %p182_p5 = scmp.ne.s32.totalorder %s283_s3, %s181_s24  ;;  %p185_p6 = scmp.lt.u32.totalorder %s181_s24, %s283_s3 }
  0xf6   :  { %p187_p7 = pnand %p185_p6, %p182_p5 }
  0xf8   :  { %190 = shalt.err (!%p187_p7)
}
  0xf9   :  { %131 = dma.vmem_to_hbm [thread:$0]  %s129_s19, 16, %s283_s3, [#allocation3]   ;;  %vm120_vm11 = vcmask 0  }
  0xfa   :  { %s219_s5 = smov [#allocation4]  }
  0xfb   :  { %s138_s6 = sshll.u32 %s219_s5, 4  ;;  %s139_s6 = int_to_ptr.vmem [resolvable:$true] %s138_s6 }
  0xfc   :  { %s191_s8 = scalar_lea.vmem %s139_s6, 16  ;;  %s195_s9 = scalar_lea.vmem %s139_s6, 32 }
  0xfd   :  { %p192_p8 = scmp.ne.s32.totalorder %s139_s6, %s191_s8  ;;  %p196_p9 = scmp.lt.s32.totalorder %s139_s6, %s139_s6 }
  0xfe   :  { %p197_p10 = scmp.lt.s32.totalorder %s195_s9, %s191_s8 }
 0x100   :  { %p198_p11 = por %p197_p10, %p196_p9 }
 0x102   :  { %p199_p12 = pnand %p198_p11, %p192_p8 }
 0x17e   :  { %v111_v10 = vpop.xlane.xlu0 %110 }
 0x17f   :  { %v112_v11 = vrot.slane %v111_v10, 4 }
 0x181   :  { %v113_v12 = vadd.f32 %v112_v11, %v111_v10 }
 0x183   :  { %v114_v13 = vrot.slane %v113_v12, 2 }
 0x185   :  { %v115_v14 = vadd.f32 %v114_v13, %v113_v12 }
 0x187   :  { %v116_v15 = vrot.slane %v115_v14, 1 }
 0x189   :  { %v117_v16 = vadd.f32 %v116_v15, %v115_v14 }
 0x18b   :  { %151 = vpush %v117_v16 }
 0x1bc   :  { %s152_s7 = spop %151 }
 0x1bd   :  { %v119_v17 = vstv %s152_s7 }
 0x1be   :  { %121 = vst.msk [vmem:[#allocation4] sm:$0x1] %vm120_vm11, %v119_v17 }
 0x1bf   :  { %202 = shalt.err (!%p199_p12)
}
 0x1c0   :  { %s203_s11 = scalar_lea.hbm %s284_s4, 16 }
 0x1c1   :  { %p204_p13 = scmp.ne.s32.totalorder %s284_s4, %s203_s11  ;;  %p207_p0 = scmp.lt.u32.totalorder %s203_s11, %s284_s4 }
 0x1c3   :  { %p209_p1 = pnand %p207_p0, %p204_p13 }
 0x1c5   :  { %212 = shalt.err (!%p209_p1)
}
 0x1c6   :  { %141 = dma.vmem_to_hbm [thread:$0]  %s139_s6, 16, %s284_s4, [#allocation5]  }
 0x1c7   :  { %213 = dma.done.wait [#allocation3], 16  }
 0x1c8   :  { %214 = vsyncadd [#allocation3], 4294967280 }
 0x1c9   :  { %215 = dma.done.wait [#allocation5], 16  }
 0x1ca   :  { %216 = vsyncadd [#allocation5], 4294967280 }
 0x1cb   :  { %148 = vsyncpa [#allocation3], 1 }
 0x1cc   :  { %149 = vsyncpa [#allocation5], 1 }

</bundles_post_ra>
